<compile_context>
chip_gen: v7x
topology: tpu7x:2x2x1
jax: 0.10.0
libtpu: 0.0.40
codegen_flags: <defaults>
</compile_context>

<pallas_src>
import functools
import math

import jax
import jax.numpy as jnp
from jax import lax
from jax.experimental import pallas as pl
from jax.experimental.pallas import tpu as pltpu


def _round_up(x, m):
    return (x + m - 1) // m * m


def _pad2d(a, rows, cols):
    return jnp.pad(a, ((0, rows - a.shape[0]), (0, cols - a.shape[1])))


def _critic_kernel(x_ref,
                   w0_ref, b0_ref, gamma_ref, beta_ref,
                   w1_ref, b1_ref,
                   w2_ref, b2_ref,
                   w3_ref, b3_ref,
                   out_ref, *, hidden_dim):
    cdt = w0_ref.dtype                    # MXU input dtype (f32 or bf16)
    inv_h = 1.0 / float(hidden_dim)       # normalize over the REAL hidden width

    x = x_ref[...].astype(cdt)

    # ----- input_layer: Linear -> ReLU -----
    h = jnp.dot(x, w0_ref[...], preferred_element_type=jnp.float32) + b0_ref[...]
    h = jnp.maximum(h, 0.0)

    # ----- LayerNorm (single-pass fused stats: E[x^2] - E[x]^2) -----
    # Padded lanes of h are exactly zero, so summing over the padded width and
    # dividing by the real hidden_dim gives the exact un-padded statistics.
    s1 = jnp.sum(h, axis=-1, keepdims=True)
    s2 = jnp.sum(h * h, axis=-1, keepdims=True)
    mean = s1 * inv_h
    var = s2 * inv_h - mean * mean
    h = (h - mean) * lax.rsqrt(var + 1e-5)
    h = h * gamma_ref[...] + beta_ref[...]   # padded gamma/beta are zero -> lanes stay zero

    # ----- value_net: Linear -> ReLU -> Linear -> ReLU -> Linear -----
    h = jnp.dot(h.astype(cdt), w1_ref[...], preferred_element_type=jnp.float32) + b1_ref[...]
    h = jnp.maximum(h, 0.0)
    h = jnp.dot(h.astype(cdt), w2_ref[...], preferred_element_type=jnp.float32) + b2_ref[...]
    h = jnp.maximum(h, 0.0)
    v = jnp.dot(h.astype(cdt), w3_ref[...], preferred_element_type=jnp.float32) + b3_ref[...]

    out_ref[...] = v.astype(out_ref.dtype)


def centralized_critic_forward(state, params, *, block_batch=512,
                               weights_dtype=jnp.float32):
    """state: (batch, state_dim) float32 -> values: (batch, num_agents) float32.

    weights_dtype=jnp.bfloat16 enables the bf16 MXU path (v6e/v7x); accumulation,
    bias adds and LayerNorm stay in float32.
    """
    batch, state_dim = state.shape
    hidden_dim = params["w0"].shape[1]
    num_agents = params["w3"].shape[1]

    # Lane-dense padded feature dims.
    sd_p = _round_up(state_dim, 128)
    h_p = _round_up(hidden_dim, 128)
    a_p = _round_up(num_agents, 128)

    # Batch tile: multiple of 8 sublanes, capped at block_batch (VMEM-safe on all gens).
    tb = min(block_batch, _round_up(batch, 8))
    batch_p = _round_up(batch, tb)

    x = _pad2d(state.astype(jnp.float32), batch_p, sd_p)

    w0 = _pad2d(params["w0"], sd_p, h_p).astype(weights_dtype)
    w1 = _pad2d(params["w1"], h_p, h_p).astype(weights_dtype)
    w2 = _pad2d(params["w2"], h_p, h_p).astype(weights_dtype)
    w3 = _pad2d(params["w3"], h_p, a_p).astype(weights_dtype)
    b0 = _pad2d(params["b0"], 1, h_p).astype(jnp.float32)
    gm = _pad2d(params["ln_gamma"], 1, h_p).astype(jnp.float32)
    bt = _pad2d(params["ln_beta"], 1, h_p).astype(jnp.float32)
    b1 = _pad2d(params["b1"], 1, h_p).astype(jnp.float32)
    b2 = _pad2d(params["b2"], 1, h_p).astype(jnp.float32)
    b3 = _pad2d(params["b3"], 1, a_p).astype(jnp.float32)

    operands = (x, w0, b0, gm, bt, w1, b1, w2, b2, w3, b3)

    def pinned(shape):
        # Full array as one block, same block index every step -> stays resident in VMEM.
        return pl.BlockSpec(shape, lambda i: (0, 0))

    in_specs = [pl.BlockSpec((tb, sd_p), lambda i: (i, 0))] + \
               [pinned(op.shape) for op in operands[1:]]
    out_specs = pl.BlockSpec((tb, a_p), lambda i: (i, 0))

    grid = (batch_p // tb,)

    flops = 2 * batch_p * (sd_p * h_p + 2 * h_p * h_p + h_p * a_p)
    bytes_accessed = int(
        x.size * x.dtype.itemsize
        + sum(int(op.size) * op.dtype.itemsize for op in operands[1:])
        + batch_p * a_p * 4
    )

    kernel = functools.partial(_critic_kernel, hidden_dim=hidden_dim)

    out = pl.pallas_call(
        kernel,
        out_shape=jax.ShapeDtypeStruct((batch_p, a_p), jnp.float32),
        grid_spec=pltpu.PrefetchScalarGridSpec(
            num_scalar_prefetch=0,
            grid=grid,
            in_specs=in_specs,
            out_specs=out_specs,
        ),
        compiler_params=pltpu.CompilerParams(
            dimension_semantics=("parallel",),
        ),
        cost_estimate=pl.CostEstimate(
            flops=flops,
            transcendentals=batch_p,          # one rsqrt per row
            bytes_accessed=bytes_accessed,
        ),
    )(*operands)

    return out[:batch, :num_agents]


def init_params(key, state_dim, hidden_dim, num_agents):
    """Deterministic init matching the module: orthogonal(gain=sqrt(2)) weights, zero biases,
    LayerNorm gamma=1, beta=0. Weights stored transposed: (in_dim, out_dim)."""
    gain = math.sqrt(2.0)
    ortho = jax.nn.initializers.orthogonal(scale=gain)
    k0, k1, k2, k3 = jax.random.split(key, 4)

    def make_w(k, in_dim, out_dim):
        # PyTorch weight is (out, in); we store the transpose (in, out) for x @ W.
        w_pt = ortho(k, (out_dim, in_dim), jnp.float32)
        return jnp.transpose(w_pt)

    return {
        "w0": make_w(k0, state_dim, hidden_dim),
        "b0": jnp.zeros((1, hidden_dim), jnp.float32),
        "ln_gamma": jnp.ones((1, hidden_dim), jnp.float32),
        "ln_beta": jnp.zeros((1, hidden_dim), jnp.float32),
        "w1": make_w(k1, hidden_dim, hidden_dim),
        "b1": jnp.zeros((1, hidden_dim), jnp.float32),
        "w2": make_w(k2, hidden_dim, hidden_dim),
        "b2": jnp.zeros((1, hidden_dim), jnp.float32),
        "w3": make_w(k3, hidden_dim, num_agents),
        "b3": jnp.zeros((1, num_agents), jnp.float32),
    }


def _reference_forward(state, params):
    """Pure-JAX reference for correctness checking."""
    h = jnp.maximum(state @ params["w0"] + params["b0"], 0.0)
    mean = jnp.mean(h, axis=-1, keepdims=True)
    var = jnp.mean((h - mean) ** 2, axis=-1, keepdims=True)
    h = (h - mean) / jnp.sqrt(var + 1e-5) * params["ln_gamma"] + params["ln_beta"]
    h = jnp.maximum(h @ params["w1"] + params["b1"], 0.0)
    h = jnp.maximum(h @ params["w2"] + params["b2"], 0.0)
    return h @ params["w3"] + params["b3"]


if __name__ == "__main__":
    batch, state_dim, hidden_dim, num_agents = 2, 16, 32, 4

    key = jax.random.PRNGKey(0)
    k_state, k_params = jax.random.split(key)

    state = jax.random.normal(k_state, (batch, state_dim), dtype=jnp.float32)
    params = init_params(k_params, state_dim, hidden_dim, num_agents)

    # f32 path, tight tolerance.
    values = jax.block_until_ready(centralized_critic_forward(state, params))
    ref = _reference_forward(state, params)
    assert values.shape == (batch, num_agents)
    assert jnp.allclose(values, ref, atol=1e-4, rtol=1e-4)

    # bf16-weight MXU path (f32 accumulation + f32 LayerNorm), looser tolerance.
    values_bf16 = jax.block_until_ready(
        centralized_critic_forward(state, params, weights_dtype=jnp.bfloat16))
    assert jnp.allclose(values_bf16, ref, atol=1e-1, rtol=1e-1)

    # Larger batch: exercises the batch grid, pinned-weight BlockSpecs and padding path.
    big_state = jax.random.normal(k_state, (1500, state_dim), dtype=jnp.float32)
    big_vals = jax.block_until_ready(centralized_critic_forward(big_state, params))
    big_ref = _reference_forward(big_state, params)
    assert big_vals.shape == (1500, num_agents)
    assert jnp.allclose(big_vals, big_ref, atol=1e-4, rtol=1e-4)

    print("KERNEL_OK")
</pallas_src>

<mosaic_0001>
module attributes {stable_mosaic.version = 11 : i64} {
  func.func @_critic_kernel(%arg0: i32, %arg1: memref<8x128xf32, #tpu.memory_space<vmem>>, %arg2: memref<128x128xf32, #tpu.memory_space<vmem>>, %arg3: memref<1x128xf32, #tpu.memory_space<vmem>>, %arg4: memref<1x128xf32, #tpu.memory_space<vmem>>, %arg5: memref<1x128xf32, #tpu.memory_space<vmem>>, %arg6: memref<128x128xf32, #tpu.memory_space<vmem>>, %arg7: memref<1x128xf32, #tpu.memory_space<vmem>>, %arg8: memref<128x128xf32, #tpu.memory_space<vmem>>, %arg9: memref<1x128xf32, #tpu.memory_space<vmem>>, %arg10: memref<128x128xf32, #tpu.memory_space<vmem>>, %arg11: memref<1x128xf32, #tpu.memory_space<vmem>>, %arg12: memref<8x128xf32, #tpu.memory_space<vmem>>) attributes {dimension_semantics = [#tpu.dimension_semantics<parallel>], iteration_bounds = array<i64: 1>, scalar_prefetch = 0 : i64, scratch_operands = 0 : i64, tpu.core_type = #tpu.core_type<tc>, window_params = [{transform_indices = @transform_0, window_bounds = array<i64: 8, 128>}, {pipeline_mode = #tpu.pipeline_mode<synchronous>, transform_indices = @transform_1, window_bounds = array<i64: 128, 128>}, {pipeline_mode = #tpu.pipeline_mode<synchronous>, transform_indices = @transform_2, window_bounds = array<i64: 1, 128>}, {pipeline_mode = #tpu.pipeline_mode<synchronous>, transform_indices = @transform_3, window_bounds = array<i64: 1, 128>}, {pipeline_mode = #tpu.pipeline_mode<synchronous>, transform_indices = @transform_4, window_bounds = array<i64: 1, 128>}, {pipeline_mode = #tpu.pipeline_mode<synchronous>, transform_indices = @transform_5, window_bounds = array<i64: 128, 128>}, {pipeline_mode = #tpu.pipeline_mode<synchronous>, transform_indices = @transform_6, window_bounds = array<i64: 1, 128>}, {pipeline_mode = #tpu.pipeline_mode<synchronous>, transform_indices = @transform_7, window_bounds = array<i64: 128, 128>}, {pipeline_mode = #tpu.pipeline_mode<synchronous>, transform_indices = @transform_8, window_bounds = array<i64: 1, 128>}, {pipeline_mode = #tpu.pipeline_mode<synchronous>, transform_indices = @transform_9, window_bounds = array<i64: 128, 128>}, {pipeline_mode = #tpu.pipeline_mode<synchronous>, transform_indices = @transform_10, window_bounds = array<i64: 1, 128>}, {transform_indices = @transform_11, window_bounds = array<i64: 8, 128>}]} {
    %c0 = arith.constant 0 : index
    %c0_0 = arith.constant 0 : index
    %0 = vector.load %arg1[%c0, %c0_0] : memref<8x128xf32, #tpu.memory_space<vmem>>, vector<8x128xf32>
    %c0_1 = arith.constant 0 : index
    %c0_2 = arith.constant 0 : index
    %1 = vector.load %arg2[%c0_1, %c0_2] : memref<128x128xf32, #tpu.memory_space<vmem>>, vector<128x128xf32>
    %cst = arith.constant dense<0.000000e+00> : vector<8x128xf32>
    %2 = tpu.matmul %0, %1, %cst {dimension_numbers = #tpu.dot_dimension_numbers<[1], [0], [0], [1], [0, 0, 1, 1], [], []>} : vector<8x128xf32>, vector<128x128xf32>, vector<8x128xf32> -> vector<8x128xf32>
    %c0_3 = arith.constant 0 : index
    %c0_4 = arith.constant 0 : index
    %3 = vector.load %arg3[%c0_3, %c0_4] : memref<1x128xf32, #tpu.memory_space<vmem>>, vector<1x128xf32>
    %4 = vector.broadcast %3 : vector<1x128xf32> to vector<8x128xf32>
    %5 = arith.addf %2, %4 : vector<8x128xf32>
    %cst_5 = arith.constant 0.000000e+00 : f32
    %6 = vector.broadcast %cst_5 : f32 to vector<8x128xf32>
    %7 = arith.maximumf %5, %6 : vector<8x128xf32>
    %cst_6 = arith.constant dense<0.000000e+00> : vector<8xf32>
    %8 = vector.multi_reduction <add>, %7, %cst_6 [1] : vector<8x128xf32> to vector<8xf32>
    %9 = vector.shape_cast %8 : vector<8xf32> to vector<8x1xf32>
    %10 = arith.mulf %7, %7 : vector<8x128xf32>
    %cst_7 = arith.constant dense<0.000000e+00> : vector<8xf32>
    %11 = vector.multi_reduction <add>, %10, %cst_7 [1] : vector<8x128xf32> to vector<8xf32>
    %12 = vector.shape_cast %11 : vector<8xf32> to vector<8x1xf32>
    %cst_8 = arith.constant 3.125000e-02 : f32
    %13 = vector.broadcast %cst_8 : f32 to vector<8x1xf32>
    %14 = arith.mulf %9, %13 : vector<8x1xf32>
    %cst_9 = arith.constant 3.125000e-02 : f32
    %15 = vector.broadcast %cst_9 : f32 to vector<8x1xf32>
    %16 = arith.mulf %12, %15 : vector<8x1xf32>
    %17 = arith.mulf %14, %14 : vector<8x1xf32>
    %18 = arith.subf %16, %17 : vector<8x1xf32>
    %19 = vector.broadcast %14 : vector<8x1xf32> to vector<8x128xf32>
    %20 = arith.subf %7, %19 : vector<8x128xf32>
    %cst_10 = arith.constant 9.99999974E-6 : f32
    %21 = vector.broadcast %cst_10 : f32 to vector<8x1xf32>
    %22 = arith.addf %18, %21 : vector<8x1xf32>
    %23 = math.rsqrt %22 : vector<8x1xf32>
    %24 = vector.broadcast %23 : vector<8x1xf32> to vector<8x128xf32>
    %25 = arith.mulf %20, %24 : vector<8x128xf32>
    %c0_11 = arith.constant 0 : index
    %c0_12 = arith.constant 0 : index
    %26 = vector.load %arg4[%c0_11, %c0_12] : memref<1x128xf32, #tpu.memory_space<vmem>>, vector<1x128xf32>
    %27 = vector.broadcast %26 : vector<1x128xf32> to vector<8x128xf32>
    %28 = arith.mulf %25, %27 : vector<8x128xf32>
    %c0_13 = arith.constant 0 : index
    %c0_14 = arith.constant 0 : index
    %29 = vector.load %arg5[%c0_13, %c0_14] : memref<1x128xf32, #tpu.memory_space<vmem>>, vector<1x128xf32>
    %30 = vector.broadcast %29 : vector<1x128xf32> to vector<8x128xf32>
    %31 = arith.addf %28, %30 : vector<8x128xf32>
    %c0_15 = arith.constant 0 : index
    %c0_16 = arith.constant 0 : index
    %32 = vector.load %arg6[%c0_15, %c0_16] : memref<128x128xf32, #tpu.memory_space<vmem>>, vector<128x128xf32>
    %cst_17 = arith.constant dense<0.000000e+00> : vector<8x128xf32>
    %33 = tpu.matmul %31, %32, %cst_17 {dimension_numbers = #tpu.dot_dimension_numbers<[1], [0], [0], [1], [0, 0, 1, 1], [], []>} : vector<8x128xf32>, vector<128x128xf32>, vector<8x128xf32> -> vector<8x128xf32>
    %c0_18 = arith.constant 0 : index
    %c0_19 = arith.constant 0 : index
    %34 = vector.load %arg7[%c0_18, %c0_19] : memref<1x128xf32, #tpu.memory_space<vmem>>, vector<1x128xf32>
    %35 = vector.broadcast %34 : vector<1x128xf32> to vector<8x128xf32>
    %36 = arith.addf %33, %35 : vector<8x128xf32>
    %cst_20 = arith.constant 0.000000e+00 : f32
    %37 = vector.broadcast %cst_20 : f32 to vector<8x128xf32>
    %38 = arith.maximumf %36, %37 : vector<8x128xf32>
    %c0_21 = arith.constant 0 : index
    %c0_22 = arith.constant 0 : index
    %39 = vector.load %arg8[%c0_21, %c0_22] : memref<128x128xf32, #tpu.memory_space<vmem>>, vector<128x128xf32>
    %cst_23 = arith.constant dense<0.000000e+00> : vector<8x128xf32>
    %40 = tpu.matmul %38, %39, %cst_23 {dimension_numbers = #tpu.dot_dimension_numbers<[1], [0], [0], [1], [0, 0, 1, 1], [], []>} : vector<8x128xf32>, vector<128x128xf32>, vector<8x128xf32> -> vector<8x128xf32>
    %c0_24 = arith.constant 0 : index
    %c0_25 = arith.constant 0 : index
    %41 = vector.load %arg9[%c0_24, %c0_25] : memref<1x128xf32, #tpu.memory_space<vmem>>, vector<1x128xf32>
    %42 = vector.broadcast %41 : vector<1x128xf32> to vector<8x128xf32>
    %43 = arith.addf %40, %42 : vector<8x128xf32>
    %cst_26 = arith.constant 0.000000e+00 : f32
    %44 = vector.broadcast %cst_26 : f32 to vector<8x128xf32>
    %45 = arith.maximumf %43, %44 : vector<8x128xf32>
    %c0_27 = arith.constant 0 : index
    %c0_28 = arith.constant 0 : index
    %46 = vector.load %arg10[%c0_27, %c0_28] : memref<128x128xf32, #tpu.memory_space<vmem>>, vector<128x128xf32>
    %cst_29 = arith.constant dense<0.000000e+00> : vector<8x128xf32>
    %47 = tpu.matmul %45, %46, %cst_29 {dimension_numbers = #tpu.dot_dimension_numbers<[1], [0], [0], [1], [0, 0, 1, 1], [], []>} : vector<8x128xf32>, vector<128x128xf32>, vector<8x128xf32> -> vector<8x128xf32>
    %c0_30 = arith.constant 0 : index
    %c0_31 = arith.constant 0 : index
    %48 = vector.load %arg11[%c0_30, %c0_31] : memref<1x128xf32, #tpu.memory_space<vmem>>, vector<1x128xf32>
    %49 = vector.broadcast %48 : vector<1x128xf32> to vector<8x128xf32>
    %50 = arith.addf %47, %49 : vector<8x128xf32>
    %c0_32 = arith.constant 0 : index
    %c0_33 = arith.constant 0 : index
    %51 = vector.load %arg12[%c0_32, %c0_33] : memref<8x128xf32, #tpu.memory_space<vmem>>, vector<8x128xf32>
    tpu.vector_store %arg12[%c0_32, %c0_33], %50 {strides = array<i32>} : memref<8x128xf32, #tpu.memory_space<vmem>>, vector<8x128xf32>,
    return
  }
  func.func @transform_0(%arg0: i32) -> (i32, i32) {
    %c0_i32 = arith.constant 0 : i32
    %c0_i32_0 = arith.constant 0 : i32
    return %arg0, %c0_i32 : i32, i32
  }
  func.func @transform_1(%arg0: i32) -> (i32, i32) {
    %c0_i32 = arith.constant 0 : i32
    %c0_i32_0 = arith.constant 0 : i32
    %c0_i32_1 = arith.constant 0 : i32
    return %c0_i32, %c0_i32_0 : i32, i32
  }
  func.func @transform_2(%arg0: i32) -> (i32, i32) {
    %c0_i32 = arith.constant 0 : i32
    %c0_i32_0 = arith.constant 0 : i32
    %c0_i32_1 = arith.constant 0 : i32
    return %c0_i32, %c0_i32_0 : i32, i32
  }
  func.func @transform_3(%arg0: i32) -> (i32, i32) {
    %c0_i32 = arith.constant 0 : i32
    %c0_i32_0 = arith.constant 0 : i32
    %c0_i32_1 = arith.constant 0 : i32
    return %c0_i32, %c0_i32_0 : i32, i32
  }
  func.func @transform_4(%arg0: i32) -> (i32, i32) {
    %c0_i32 = arith.constant 0 : i32
    %c0_i32_0 = arith.constant 0 : i32
    %c0_i32_1 = arith.constant 0 : i32
    return %c0_i32, %c0_i32_0 : i32, i32
  }
  func.func @transform_5(%arg0: i32) -> (i32, i32) {
    %c0_i32 = arith.constant 0 : i32
    %c0_i32_0 = arith.constant 0 : i32
    %c0_i32_1 = arith.constant 0 : i32
    return %c0_i32, %c0_i32_0 : i32, i32
  }
  func.func @transform_6(%arg0: i32) -> (i32, i32) {
    %c0_i32 = arith.constant 0 : i32
    %c0_i32_0 = arith.constant 0 : i32
    %c0_i32_1 = arith.constant 0 : i32
    return %c0_i32, %c0_i32_0 : i32, i32
  }
  func.func @transform_7(%arg0: i32) -> (i32, i32) {
    %c0_i32 = arith.constant 0 : i32
    %c0_i32_0 = arith.constant 0 : i32
    %c0_i32_1 = arith.constant 0 : i32
    return %c0_i32, %c0_i32_0 : i32, i32
  }
  func.func @transform_8(%arg0: i32) -> (i32, i32) {
    %c0_i32 = arith.constant 0 : i32
    %c0_i32_0 = arith.constant 0 : i32
    %c0_i32_1 = arith.constant 0 : i32
    return %c0_i32, %c0_i32_0 : i32, i32
  }
  func.func @transform_9(%arg0: i32) -> (i32, i32) {
    %c0_i32 = arith.constant 0 : i32
    %c0_i32_0 = arith.constant 0 : i32
    %c0_i32_1 = arith.constant 0 : i32
    return %c0_i32, %c0_i32_0 : i32, i32
  }
  func.func @transform_10(%arg0: i32) -> (i32, i32) {
    %c0_i32 = arith.constant 0 : i32
    %c0_i32_0 = arith.constant 0 : i32
    %c0_i32_1 = arith.constant 0 : i32
    return %c0_i32, %c0_i32_0 : i32, i32
  }
  func.func @transform_11(%arg0: i32) -> (i32, i32) {
    %c0_i32 = arith.constant 0 : i32
    %c0_i32_0 = arith.constant 0 : i32
    return %arg0, %c0_i32 : i32, i32
  }
}

</mosaic_0001>

<bundles_post_ra>
// kernel: tpu_custom_call.1
= control target key start
LH: loop header
LB: loop body
LE: loop exit
PB: predicated region body
PF: predicated region fallthrough
CT: control target
= control target key end

     0   :  { %16 = vsyncpa [#allocation3], 0  ;;  %s1210_s0 = inlined_call_operand.hbm [shape: f32[8,128], index: 0, kind: input, shape index: {}]   ;;  %s1211_s1 = inlined_call_operand.hbm [shape: f32[128,128], index: 1, kind: input, shape index: {}]   ;;  %s1212_s2 = inlined_call_operand.vmem [shape: f32[1,128], index: 2, kind: input, shape index: {}]   ;;  %s1213_s3 = inlined_call_operand.vmem [shape: f32[1,128], index: 3, kind: input, shape index: {}]   ;;  %s1214_s4 = inlined_call_operand.vmem [shape: f32[1,128], index: 4, kind: input, shape index: {}]   ;;  %s1215_s5 = inlined_call_operand.hbm [shape: f32[128,128], index: 5, kind: input, shape index: {}]   ;;  %s1216_s6 = inlined_call_operand.vmem [shape: f32[1,128], index: 6, kind: input, shape index: {}]   ;;  %s1217_s7 = inlined_call_operand.hbm [shape: f32[128,128], index: 7, kind: input, shape index: {}]   ;;  %s1218_s8 = inlined_call_operand.vmem [shape: f32[1,128], index: 8, kind: input, shape index: {}]   ;;  %s1219_s9 = inlined_call_operand.hbm [shape: f32[128,128], index: 9, kind: input, shape index: {}]   ;;  %s1220_s10 = inlined_call_operand.vmem [shape: f32[1,128], index: 10, kind: input, shape index: {}]   ;;  %s1221_s11 = inlined_call_operand.hbm [shape: f32[8,128], index: 11, kind: output, shape index: {}]  }
   0x1   :  { %17 = vsyncpa [#allocation6], 0 }
   0x2   :  { %18 = vsyncpa [#allocation9], 0 }
   0x3   :  { %19 = vsyncpa [#allocation4], 0  ;;  %s991_s17 = smov [#allocation5]   ;;  %s851_s21 = scalar_lea.hbm %s1211_s1, 2048 }
   0x4   :  { %s35_s18 = sshll.u32 %s991_s17, 4  ;;  %p852_p0 = scmp.ne.s32.totalorder %s1211_s1, %s851_s21  ;;  %s36_s18 = int_to_ptr.vmem [resolvable:$true] %s35_s18 }
   0x5   :  { %p855_p1 = scmp.lt.u32.totalorder %s851_s21, %s1211_s1 }
   0x7   :  { %p857_p2 = pnand %p855_p1, %p852_p0 }
   0x9   :  { %860 = shalt.err (!%p857_p2)
}
   0xa   :  { %s861_s26 = scalar_lea.vmem %s36_s18, 2048  ;;  %p866_p4 = scmp.lt.s32.totalorder %s36_s18, %s36_s18 }
   0xb   :  { %p862_p3 = scmp.ne.s32.totalorder %s36_s18, %s861_s26  ;;  %p867_p5 = scmp.lt.s32.totalorder %s861_s26, %s861_s26 }
   0xd   :  { %p868_p6 = por %p867_p5, %p866_p4 }
   0xf   :  { %p869_p7 = pnand %p868_p6, %p862_p3 }
  0x11   :  { %872 = shalt.err (!%p869_p7)
}
  0x12   :  { %s992_s27 = smov 128   ;;  %s993_s28 = smov 8  }
  0x13   :  { %41 = dma.hbm_to_vmem [thread:$0]  %s1211_s1, 2048, %s36_s18, [#allocation6], %s992_s27, %s992_s27, %s993_s28  }
  0x14   :  { %s994_s12 = smov [#allocation8]   ;;  %s995_s14 = smov [#allocation2]  }
  0x15   :  { %s67_s13 = sshll.u32 %s994_s12, 4  ;;  %s26_s15 = sshll.u32 %s995_s14, 4  ;;  %s68_s13 = int_to_ptr.vmem [resolvable:$true] %s67_s13  ;;  %s27_s15 = int_to_ptr.vmem [resolvable:$true] %s26_s15 }
  0x16   :  { %s873_s19 = scalar_lea.hbm %s1217_s7, 2048 }
  0x17   :  { %p874_p8 = scmp.ne.s32.totalorder %s1217_s7, %s873_s19  ;;  %p877_p9 = scmp.lt.u32.totalorder %s873_s19, %s1217_s7 }
  0x19   :  { %p879_p10 = pnand %p877_p9, %p874_p8 }
  0x1b   :  { %882 = shalt.err (!%p879_p10)
}
  0x1c   :  { %s883_s1 = scalar_lea.vmem %s68_s13, 2048  ;;  %p888_p12 = scmp.lt.s32.totalorder %s68_s13, %s68_s13 }
  0x1d   :  { %p884_p11 = scmp.ne.s32.totalorder %s68_s13, %s883_s1  ;;  %p889_p13 = scmp.lt.s32.totalorder %s883_s1, %s883_s1 }
  0x1f   :  { %p890_p0 = por %p889_p13, %p888_p12 }
  0x21   :  { %p891_p1 = pnand %p890_p0, %p884_p11 }
  0x23   :  { %894 = shalt.err (!%p891_p1)
}
  0x24   :  { %73 = dma.hbm_to_vmem [thread:$0]  %s1217_s7, 2048, %s68_s13, [#allocation9], %s992_s27, %s992_s27, %s993_s28  }
  0x25   :  { %s895_s29 = scalar_lea.hbm %s1210_s0, 128 }
  0x26   :  { %p896_p2 = scmp.ne.s32.totalorder %s1210_s0, %s895_s29  ;;  %p899_p3 = scmp.lt.u32.totalorder %s895_s29, %s1210_s0 }
  0x28   :  { %p901_p4 = pnand %p899_p3, %p896_p2 }
  0x2a   :  { %904 = shalt.err (!%p901_p4)
}
  0x2b   :  { %s905_s17 = scalar_lea.vmem %s27_s15, 128  ;;  %p910_p6 = scmp.lt.s32.totalorder %s27_s15, %s27_s15 }
  0x2c   :  { %p906_p5 = scmp.ne.s32.totalorder %s27_s15, %s905_s17  ;;  %p911_p7 = scmp.lt.s32.totalorder %s905_s17, %s905_s17 }
  0x2e   :  { %p912_p8 = por %p911_p7, %p910_p6 }
  0x30   :  { %p913_p9 = pnand %p912_p8, %p906_p5 }
  0x32   :  { %916 = shalt.err (!%p913_p9)
}
  0x33   :  { %29 = dma.hbm_to_vmem [thread:$0]  %s1210_s0, 128, %s27_s15, [#allocation3]  }
  0x34   :  { %s996_s19 = smov [#allocation7]   ;;  %s997_s21 = smov [#allocation10]  }
  0x35   :  { %s53_s20 = sshll.u32 %s996_s19, 4  ;;  %s81_s22 = sshll.u32 %s997_s21, 4  ;;  %s54_s20 = int_to_ptr.vmem [resolvable:$true] %s53_s20  ;;  %s82_s22 = int_to_ptr.vmem [resolvable:$true] %s81_s22 }
  0x36   :  { %s917_s18 = scalar_lea.hbm %s1215_s5, 2048 }
  0x37   :  { %p918_p10 = scmp.ne.s32.totalorder %s1215_s5, %s917_s18  ;;  %p921_p11 = scmp.lt.u32.totalorder %s917_s18, %s1215_s5 }
  0x39   :  { %p923_p12 = pnand %p921_p11, %p918_p10 }
  0x3b   :  { %926 = shalt.err (!%p923_p12)
}
  0x3c   :  { %s927_s0 = scalar_lea.vmem %s54_s20, 2048  ;;  %p932_p0 = scmp.lt.s32.totalorder %s54_s20, %s54_s20 }
  0x3d   :  { %p928_p13 = scmp.ne.s32.totalorder %s54_s20, %s927_s0  ;;  %p933_p1 = scmp.lt.s32.totalorder %s927_s0, %s927_s0 }
  0x3f   :  { %p934_p2 = por %p933_p1, %p932_p0 }
  0x41   :  { %p935_p3 = pnand %p934_p2, %p928_p13 }
  0x43   :  { %938 = shalt.err (!%p935_p3)
}
  0x44   :  { %59 = dma.hbm_to_vmem [thread:$0]  %s1215_s5, 2048, %s54_s20, [#allocation6], %s992_s27, %s992_s27, %s993_s28  }
  0x45   :  { %s939_s16 = scalar_lea.hbm %s1219_s9, 2048 }
  0x46   :  { %p940_p4 = scmp.ne.s32.totalorder %s1219_s9, %s939_s16  ;;  %p943_p5 = scmp.lt.u32.totalorder %s939_s16, %s1219_s9 }
  0x48   :  { %p945_p6 = pnand %p943_p5, %p940_p4 }
  0x4a   :  { %948 = shalt.err (!%p945_p6)
}
  0x4b   :  { %s949_s21 = scalar_lea.vmem %s82_s22, 2048  ;;  %p954_p8 = scmp.lt.s32.totalorder %s82_s22, %s82_s22 }
  0x4c   :  { %p950_p7 = scmp.ne.s32.totalorder %s82_s22, %s949_s21  ;;  %p955_p9 = scmp.lt.s32.totalorder %s949_s21, %s949_s21 }
  0x4e   :  { %p956_p10 = por %p955_p9, %p954_p8 }
  0x50   :  { %p957_p11 = pnand %p956_p10, %p950_p7 }
  0x52   :  { %960 = shalt.err (!%p957_p11)
}
  0x53   :  { %87 = dma.hbm_to_vmem [thread:$0]  %s1219_s9, 2048, %s82_s22, [#allocation9], %s992_s27, %s992_s27, %s993_s28  }
  0x54   :  { %983 = dma.done.wait [#allocation3], 128  }
  0x55   :  { %984 = vsyncadd [#allocation3], 4294967168 }
  0x56   :  { %985 = dma.done.wait [#allocation6], 4096  }
  0x57   :  { %986 = vsyncadd [#allocation6], 4294963200 }
  0x58   :  { %987 = dma.done.wait [#allocation9], 4096  }
  0x59   :  { %988 = vsyncadd [#allocation9], 4294963200  ;;  %v998_v0 = vmov 0.0|0.0   ;;  %vm999_vm0 = vmmov 0   ;;  %v1000_v1 = vmov 0.0   ;;  %v106_v2 = vld [vmem:[#allocation5] sm:$0xff] }
  0x5a   :  { %742 = vmatprep.subr.bf16.mxu0 %v998_v0  ;;  %634 = vmatprep.mubr.msk.f32.mxu0 %vm999_vm0, %v1000_v1  ;;  %v107_v3 = vld [vmem:[#allocation5 + $0x8] sm:$0xff]  ;;  %v108_v4 = vld [vmem:[#allocation5 + $0x10] sm:$0xff]  ;;  %v109_v6 = vld [vmem:[#allocation5 + $0x18] sm:$0xff]  ;;  %s1001_s25 = smov [#allocation11]  }
  0x5b   :  { %766 = vmatprep.subr.bf16.mxu1 %v998_v0  ;;  %669 = vmatprep.mubr.msk.f32.mxu1 %vm999_vm0, %v1000_v1  ;;  %v743_v5 = vpack.c.bf16 %v107_v3, %v106_v2  ;;  %v746_v7 = vpack.c.bf16 %v109_v6, %v108_v4  ;;  %v110_v8 = vld [vmem:[#allocation5 + $0x20] sm:$0xff]  ;;  %v111_v9 = vld [vmem:[#allocation5 + $0x28] sm:$0xff]  ;;  %v112_v11 = vld [vmem:[#allocation5 + $0x30] sm:$0xff]  ;;  %s517_s26 = sshll.u32 %s1001_s25, 4  ;;  %s518_s26 = int_to_ptr.vmem [resolvable:$true] %s517_s26 }
  0x5c   :  { %v749_v10 = vpack.c.bf16 %v111_v9, %v110_v8  ;;  %v113_v12 = vld [vmem:[#allocation5 + $0x38] sm:$0xff]  ;;  %v114_v14 = vld [vmem:[#allocation5 + $0x40] sm:$0xff]  ;;  %v115_v15 = vld [vmem:[#allocation5 + $0x48] sm:$0xff]  ;;  %s961_s29 = scalar_lea.vmem %s518_s26, 128  ;;  %p966_p13 = scmp.lt.s32.totalorder %s518_s26, %s518_s26 }
  0x5d   :  { %744 = vmatpush3.bf16.msra.mxu0 %v743_v5  ;;  %v752_v13 = vpack.c.bf16 %v113_v12, %v112_v11  ;;  %v755_v16 = vpack.c.bf16 %v115_v15, %v114_v14  ;;  %v116_v17 = vld [vmem:[#allocation5 + $0x50] sm:$0xff]  ;;  %v117_v18 = vld [vmem:[#allocation5 + $0x58] sm:$0xff]  ;;  %v118_v20 = vld [vmem:[#allocation5 + $0x60] sm:$0xff]  ;;  %p962_p12 = scmp.ne.s32.totalorder %s518_s26, %s961_s29  ;;  %p967_p0 = scmp.lt.s32.totalorder %s961_s29, %s961_s29 }
  0x5e   :  { %745 = vmatprep.subr.bf16.mxu0 %v998_v0  ;;  %v758_v19 = vpack.c.bf16 %v117_v18, %v116_v17  ;;  %v119_v21 = vld [vmem:[#allocation5 + $0x68] sm:$0xff]  ;;  %v120_v23 = vld [vmem:[#allocation5 + $0x70] sm:$0xff]  ;;  %v121_v24 = vld [vmem:[#allocation5 + $0x78] sm:$0xff] }
  0x5f   :  { %v761_v22 = vpack.c.bf16 %v119_v21, %v118_v20  ;;  %v764_v25 = vpack.c.bf16 %v121_v24, %v120_v23  ;;  %v105_v26 = vld [vmem:[#allocation2] sm:$0xff]  ;;  %v229_v27 = vld [vmem:[#allocation7] sm:$0xff]  ;;  %v230_v28 = vld [vmem:[#allocation7 + $0x8] sm:$0xff]  ;;  %p968_p1 = por %p967_p0, %p966_p13 }
  0x60   :  { %v767_v29 = vpack.c.bf16 %v230_v28, %v229_v27  ;;  %v528_v30 = vld [vmem:[%s1212_s2] ss:$0 sm:$0xff]  ;;  %v231_v36 = vld [vmem:[#allocation7 + $0x10] sm:$0xff]  ;;  %v233_v39 = vld [vmem:[#allocation7 + $0x20] sm:$0xff] }
  0x61   :  { %747 = vmatpush3.bf16.msra.mxu0 %v746_v7  ;;  %v232_v37 = vld [vmem:[#allocation7 + $0x18] sm:$0xff]  ;;  %v234_v40 = vld [vmem:[#allocation7 + $0x28] sm:$0xff]  ;;  %v235_v42 = vld [vmem:[#allocation7 + $0x30] sm:$0xff]  ;;  %p969_p2 = pnand %p968_p1, %p962_p12 }
  0x62   :  { %748 = vmatprep.subr.bf16.mxu0 %v998_v0  ;;  %768 = vmatpush3.bf16.msra.mxu1 %v767_v29  ;;  %v770_v38 = vpack.c.bf16 %v232_v37, %v231_v36  ;;  %v773_v41 = vpack.c.bf16 %v234_v40, %v233_v39  ;;  %v236_v43 = vld [vmem:[#allocation7 + $0x38] sm:$0xff]  ;;  %v237_v45 = vld [vmem:[#allocation7 + $0x40] sm:$0xff]  ;;  %v238_v46 = vld [vmem:[#allocation7 + $0x48] sm:$0xff] }
  0x63   :  { %769 = vmatprep.subr.bf16.mxu1 %v998_v0  ;;  %v776_v44 = vpack.c.bf16 %v236_v43, %v235_v42  ;;  %v779_v47 = vpack.c.bf16 %v238_v46, %v237_v45  ;;  %v239_v48 = vld [vmem:[#allocation7 + $0x50] sm:$0xff]  ;;  %v240_v49 = vld [vmem:[#allocation7 + $0x58] sm:$0xff]  ;;  %v241_v51 = vld [vmem:[#allocation7 + $0x60] sm:$0xff] }
  0x64   :  { %v782_v50 = vpack.c.bf16 %v240_v49, %v239_v48  ;;  %v242_v52 = vld [vmem:[#allocation7 + $0x68] sm:$0xff]  ;;  %v243_v54 = vld [vmem:[#allocation7 + $0x70] sm:$0xff]  ;;  %v244_v55 = vld [vmem:[#allocation7 + $0x78] sm:$0xff] }
  0x65   :  { %750 = vmatpush3.bf16.msra.mxu0 %v749_v10  ;;  %v785_v53 = vpack.c.bf16 %v242_v52, %v241_v51  ;;  %v788_v56 = vpack.c.bf16 %v244_v55, %v243_v54  ;;  %v323_v57 = vld [vmem:[#allocation8] sm:$0xff]  ;;  %v324_v58 = vld [vmem:[#allocation8 + $0x8] sm:$0xff]  ;;  %v325_v59 = vld [vmem:[#allocation8 + $0x10] sm:$0xff] }
  0x66   :  { %751 = vmatprep.subr.bf16.mxu0 %v998_v0  ;;  %771 = vmatpush3.bf16.msra.mxu1 %v770_v38  ;;  %v791_v60 = vpack.c.bf16 %v324_v58, %v323_v57  ;;  %v326_v61 = vld [vmem:[#allocation8 + $0x18] sm:$0xff]  ;;  %v327_v63 = vld [vmem:[#allocation8 + $0x20] sm:$0xff]  ;;  %v328_v2 = vld [vmem:[#allocation8 + $0x28] sm:$0xff] }
  0x67   :  { %772 = vmatprep.subr.bf16.mxu1 %v998_v0  ;;  %v794_v62 = vpack.c.bf16 %v326_v61, %v325_v59  ;;  %v797_v3 = vpack.c.bf16 %v328_v2, %v327_v63  ;;  %v329_v4 = vld [vmem:[#allocation8 + $0x30] sm:$0xff]  ;;  %v330_v5 = vld [vmem:[#allocation8 + $0x38] sm:$0xff]  ;;  %v331_v7 = vld [vmem:[#allocation8 + $0x40] sm:$0xff] }
  0x68   :  { %v800_v6 = vpack.c.bf16 %v330_v5, %v329_v4  ;;  %v332_v8 = vld [vmem:[#allocation8 + $0x48] sm:$0xff]  ;;  %v333_v10 = vld [vmem:[#allocation8 + $0x50] sm:$0xff]  ;;  %v334_v11 = vld [vmem:[#allocation8 + $0x58] sm:$0xff] }
  0x69   :  { %753 = vmatpush3.bf16.msra.mxu0 %v752_v13  ;;  %v803_v9 = vpack.c.bf16 %v332_v8, %v331_v7  ;;  %v806_v12 = vpack.c.bf16 %v334_v11, %v333_v10  ;;  %v335_v13 = vld [vmem:[#allocation8 + $0x60] sm:$0xff]  ;;  %v336_v14 = vld [vmem:[#allocation8 + $0x68] sm:$0xff]  ;;  %v530_v27 = vld [vmem:[%s1214_s4] ss:$0 sm:$0xff] }
  0x6a   :  { %754 = vmatprep.subr.bf16.mxu0 %v998_v0  ;;  %774 = vmatpush3.bf16.msra.mxu1 %v773_v41  ;;  %v809_v15 = vpack.c.bf16 %v336_v14, %v335_v13  ;;  %v420_v37 = vld [vmem:[#allocation10 + $0x18] sm:$0xff]  ;;  %v421_v39 = vld [vmem:[#allocation10 + $0x20] sm:$0xff]  ;;  %v422_v40 = vld [vmem:[#allocation10 + $0x28] sm:$0xff] }
  0x6b   :  { %775 = vmatprep.subr.bf16.mxu1 %v998_v0  ;;  %v821_v41 = vpack.c.bf16 %v422_v40, %v421_v39  ;;  %v424_v42 = vld [vmem:[#allocation10 + $0x38] sm:$0xff]  ;;  %v426_v45 = vld [vmem:[#allocation10 + $0x48] sm:$0xff]  ;;  %v431_v58 = vld [vmem:[#allocation10 + $0x70] sm:$0xff] }
  0x6c   :  { %v428_v48 = vld [vmem:[#allocation10 + $0x58] sm:$0xff]  ;;  %v430_v51 = vld [vmem:[#allocation10 + $0x68] sm:$0xff] }
  0x6d   :  { %756 = vmatpush3.bf16.msra.mxu0 %v755_v16  ;;  %v432_v59 = vld [vmem:[#allocation10 + $0x78] sm:$0xff] }
  0x6e   :  { %757 = vmatprep.subr.bf16.mxu0 %v998_v0  ;;  %777 = vmatpush3.bf16.msra.mxu1 %v776_v44  ;;  %v425_v44 = vld [vmem:[#allocation10 + $0x40] sm:$0xff]  ;;  %v532_v61 = vld [vmem:[%s1218_s8] ss:$0 sm:$0xff] }
  0x6f   :  { %778 = vmatprep.subr.bf16.mxu1 %v998_v0  ;;  %v827_v46 = vpack.c.bf16 %v426_v45, %v425_v44 }
  0x71   :  { %759 = vmatpush3.bf16.msra.mxu0 %v758_v19 }
  0x72   :  { %760 = vmatprep.subr.bf16.mxu0 %v998_v0  ;;  %780 = vmatpush3.bf16.msra.mxu1 %v779_v47  ;;  %v427_v47 = vld [vmem:[#allocation10 + $0x50] sm:$0xff] }
  0x73   :  { %781 = vmatprep.subr.bf16.mxu1 %v998_v0  ;;  %v830_v49 = vpack.c.bf16 %v428_v48, %v427_v47 }
  0x75   :  { %762 = vmatpush3.bf16.msra.mxu0 %v761_v22 }
  0x76   :  { %763 = vmatprep.subr.bf16.mxu0 %v998_v0  ;;  %783 = vmatpush3.bf16.msra.mxu1 %v782_v50  ;;  %v429_v50 = vld [vmem:[#allocation10 + $0x60] sm:$0xff] }
  0x77   :  { %784 = vmatprep.subr.bf16.mxu1 %v998_v0  ;;  %v833_v52 = vpack.c.bf16 %v430_v51, %v429_v50 }
  0x79   :  { %765 = vmatpush3.bf16.msra.mxu0 %v764_v25  ;;  %v529_v25 = vld [vmem:[%s1213_s3] ss:$0 sm:$0xff] }
  0x7a   :  { %790 = vmatprep.subr.bf16.mxu0 %v998_v0  ;;  %786 = vmatpush3.bf16.msra.mxu1 %v785_v53  ;;  %v531_v53 = vld [vmem:[%s1216_s6] ss:$0 sm:$0xff] }
  0x7b   :  { %787 = vmatprep.subr.bf16.mxu1 %v998_v0 }
  0x7c   :  { %635 = vmatmul.mubr.f32.vlgmr.msra.gmra.mrb[0].mxu0 %v105_v26 }
  0x7d   :  { %704 = vmatprep.mubr.msk.f32.mxu0 %vm999_vm0, %v1000_v1  ;;  %792 = vmatpush3.bf16.msra.mxu0 %v791_v60  ;;  %v836_v60 = vpack.c.bf16 %v432_v59, %v431_v58 }
  0x7e   :  { %789 = vmatpush3.bf16.msra.mxu1 %v788_v56  ;;  %793 = vmatprep.subr.bf16.mxu0 %v998_v0 }
  0x7f   :  { %814 = vmatprep.subr.bf16.mxu1 %v998_v0 }
  0x81   :  { %795 = vmatpush3.bf16.msra.mxu0 %v794_v62 }
  0x82   :  { %796 = vmatprep.subr.bf16.mxu0 %v998_v0 }
  0x85   :  { %798 = vmatpush3.bf16.msra.mxu0 %v797_v3  ;;  %v533_v3 = vld [vmem:[%s1220_s10] ss:$0 sm:$0xff] }
  0x86   :  { %799 = vmatprep.subr.bf16.mxu0 %v998_v0 }
  0x89   :  { %801 = vmatpush3.bf16.msra.mxu0 %v800_v6 }
  0x8a   :  { %802 = vmatprep.subr.bf16.mxu0 %v998_v0 }
  0x8d   :  { %804 = vmatpush3.bf16.msra.mxu0 %v803_v9 }
  0x8e   :  { %805 = vmatprep.subr.bf16.mxu0 %v998_v0 }
  0x91   :  { %807 = vmatpush3.bf16.msra.mxu0 %v806_v12 }
  0x92   :  { %808 = vmatprep.subr.bf16.mxu0 %v998_v0 }
  0x95   :  { %810 = vmatpush3.bf16.msra.mxu0 %v809_v15 }
  0x96   :  { %811 = vmatprep.subr.bf16.mxu0 %v998_v0 }
 0x14f   :  { %v195_v31 = vpop.f32.mrb[0].mxu0 }
 0x150   :  { %v196_v32 = vadd.f32 %v528_v30, %v195_v31  ;;  %v636_v33 = vpop.f32.mrb[1].mxu0  ;;  %v337_v30 = vld [vmem:[#allocation8 + $0x70] sm:$0xff]  ;;  %v338_v31 = vld [vmem:[#allocation8 + $0x78] sm:$0xff] }
 0x151   :  { %v417_v33 = vld [vmem:[#allocation10] sm:$0xff] }
 0x152   :  { %v1154_v34 = vmax.f32 %v196_v32, 0.0  ;;  %v812_v32 = vpack.c.bf16 %v338_v31, %v337_v30 }
 0x154   :  { %200 = vadd.xlane.f32.xlu0 %v1154_v34  ;;  %v202_v35 = vmul.f32 %v1154_v34, %v1154_v34  ;;  %813 = vmatpush3.bf16.msra.mxu0 %v812_v32 }
 0x158   :  { %203 = vadd.xlane.f32.xlu0 %v202_v35  ;;  %v419_v35 = vld [vmem:[#allocation10 + $0x10] sm:$0xff] }
 0x159   :  { %v818_v38 = vpack.c.bf16 %v420_v37, %v419_v35 }
 0x1e1   :  { %v201_v16 = vpop.xlane.xlu0 %200 }
 0x1e2   :  { %v205_v17 = vmul.f32 0.03125, %v201_v16 }
 0x1e4   :  { %v207_v19 = vmul.f32 %v205_v17, %v205_v17  ;;  %v209_v23 = vsub.f32 %v1154_v34, %v205_v17  ;;  %v418_v34 = vld [vmem:[#allocation10 + $0x8] sm:$0xff] }
 0x1e5   :  { %v204_v18 = vpop.xlane.xlu0 %203  ;;  %v815_v36 = vpack.c.bf16 %v418_v34, %v417_v33 }
 0x1e6   :  { %v206_v20 = vmul.f32 0.03125, %v204_v18 }
 0x1e8   :  { %v208_v21 = vsub.f32 %v206_v20, %v207_v19 }
 0x1ea   :  { %v210_v22 = vadd.f32 1e-05, %v208_v21 }
 0x1ec   :  { %849 = vrsqrt.f32 %v210_v22 }
 0x1f6   :  { %v850_v24 = vpop.eup %849 }
 0x1f7   :  { %v212_v26 = vmul.f32 %v850_v24, %v209_v23 }
 0x1f9   :  { %v220_v28 = vmul.f32 %v529_v25, %v212_v26 }
 0x1fb   :  { %v228_v29 = vadd.f32 %v530_v27, %v220_v28 }
 0x1fd   :  { %670 = vmatmul.mubr.f32.vlgmr.msra.gmra.mrb[0].mxu1 %v228_v29 }
 0x1fe   :  { %739 = vmatprep.mubr.msk.f32.mxu1 %vm999_vm0, %v1000_v1  ;;  %816 = vmatpush3.bf16.msra.mxu1 %v815_v36  ;;  %v423_v1 = vld [vmem:[#allocation10 + $0x30] sm:$0xff] }
 0x1ff   :  { %817 = vmatprep.subr.bf16.mxu1 %v998_v0  ;;  %v824_v43 = vpack.c.bf16 %v424_v42, %v423_v1 }
 0x202   :  { %819 = vmatpush3.bf16.msra.mxu1 %v818_v38 }
 0x203   :  { %820 = vmatprep.subr.bf16.mxu1 %v998_v0 }
 0x206   :  { %822 = vmatpush3.bf16.msra.mxu1 %v821_v41 }
 0x207   :  { %823 = vmatprep.subr.bf16.mxu1 %v998_v0 }
 0x20a   :  { %825 = vmatpush3.bf16.msra.mxu1 %v824_v43 }
 0x20b   :  { %826 = vmatprep.subr.bf16.mxu1 %v998_v0 }
 0x20e   :  { %828 = vmatpush3.bf16.msra.mxu1 %v827_v46 }
 0x20f   :  { %829 = vmatprep.subr.bf16.mxu1 %v998_v0 }
 0x212   :  { %831 = vmatpush3.bf16.msra.mxu1 %v830_v49 }
 0x213   :  { %832 = vmatprep.subr.bf16.mxu1 %v998_v0 }
 0x216   :  { %834 = vmatpush3.bf16.msra.mxu1 %v833_v52 }
 0x217   :  { %835 = vmatprep.subr.bf16.mxu1 %v998_v0 }
 0x21a   :  { %837 = vmatpush3.bf16.msra.mxu1 %v836_v60 }
 0x2d0   :  { %v318_v54 = vpop.f32.mrb[0].mxu1 }
 0x2d1   :  { %v319_v55 = vadd.f32 %v531_v53, %v318_v54  ;;  %v671_v56 = vpop.f32.mrb[1].mxu1 }
 0x2d3   :  { %v322_v57 = vmax.f32 %v319_v55, 0.0 }
 0x2d5   :  { %705 = vmatmul.mubr.f32.vlgmr.msra.gmra.mrb[2].mxu0 %v322_v57 }
 0x3a8   :  { %v412_v62 = vpop.f32.mrb[2].mxu0 }
 0x3a9   :  { %v413_v63 = vadd.f32 %v532_v61, %v412_v62  ;;  %v706_v0 = vpop.f32.mrb[3].mxu0 }
 0x3ab   :  { %v416_v2 = vmax.f32 %v413_v63, 0.0 }
 0x3ad   :  { %740 = vmatmul.mubr.f32.vlgmr.msra.gmra.mrb[2].mxu1 %v416_v2 }
 0x480   :  { %v506_v4 = vpop.f32.mrb[2].mxu1 }
 0x481   :  { %v507_v5 = vadd.f32 %v533_v3, %v506_v4  ;;  %v741_v6 = vpop.f32.mrb[3].mxu1 }
 0x483   :  { %510 = vst [vmem:[#allocation11] sm:$0xff] %v507_v5 }
 0x484   :  { %972 = shalt.err (!%p969_p2)
}
 0x485   :  { %s973_s15 = scalar_lea.hbm %s1221_s11, 128 }
 0x486   :  { %p974_p3 = scmp.ne.s32.totalorder %s1221_s11, %s973_s15  ;;  %p977_p4 = scmp.lt.u32.totalorder %s973_s15, %s1221_s11 }
 0x488   :  { %p979_p5 = pnand %p977_p4, %p974_p3 }
 0x48a   :  { %982 = shalt.err (!%p979_p5)
}
 0x48b   :  { %520 = dma.vmem_to_hbm [thread:$0]  %s518_s26, 128, %s1221_s11, [#allocation4]  }
 0x48c   :  { %989 = dma.done.wait [#allocation4], 128  }
 0x48d   :  { %990 = vsyncadd [#allocation4], 4294967168 }
 0x48e   :  { %524 = vsyncpa [#allocation3], 1 }
 0x48f   :  { %525 = vsyncpa [#allocation6], 1 }
 0x490   :  { %526 = vsyncpa [#allocation9], 1 }
 0x491   :  { %527 = vsyncpa [#allocation4], 1 }

</bundles_post_ra>
